<compile_context>
chip_gen: v5e
topology: v5e:2x2
jax: 0.10.0
libtpu: 0.0.40
codegen_flags: <defaults>
</compile_context>

<pallas_src>
import jax
import jax.numpy as jnp
from jax.experimental import pallas as pl
from jax.experimental.pallas import tpu as pltpu

# Packed-parameter slab layout (rows x 128 lanes, f32):
#   rows 0..1  : w1            (2, 10)  in cols 0:10
#   row  2     : b1            (1, 10)  in cols 0:10
#   rows 3..12 : w2            (10, 8)  in cols 0:8
#   row  13    : b2            (1, 8)   in cols 0:8
#   row  14    : w3^T          (1, 8)   in cols 0:8
#   row  15    : b3            (1, 1)   in col  0
PARAM_ROWS, PARAM_COLS = 16, 128


def mlp_kernel(x_ref, p_ref, o_ref):
    x = x_ref[...]                 # (TB, 2) batch tile
    p = p_ref[...]                 # (16, 128) resident parameter slab (1 DMA, invariant)

    w1_0 = p[0:1, 0:10]            # (1, 10)
    w1_1 = p[1:2, 0:10]            # (1, 10)
    b1 = p[2:3, 0:10]              # (1, 10)
    w2 = p[3:13, 0:8]              # (10, 8)
    b2 = p[13:14, 0:8]             # (1, 8)
    w3t = p[14:15, 0:8]            # (1, 8)  == w3.T
    b3 = p[15:16, 0:1]             # (1, 1)

    # layer1 (2 -> 10): K=2 degenerate matmul -> VPU broadcast-FMA, skip the MXU.
    h1 = x[:, 0:1] * w1_0 + x[:, 1:2] * w1_1 + b1      # (TB, 10)
    h1 = jnp.maximum(h1, 0.0)

    # layer2 (10 -> 8): keep on the MXU.
    h2 = jnp.dot(h1, w2, preferred_element_type=jnp.float32) + b2   # (TB, 8)
    h2 = jnp.maximum(h2, 0.0)

    # layer3 (8 -> 1): N=1 degenerate matmul -> VPU multiply + XLU lane reduction.
    z = jnp.sum(h2 * w3t, axis=-1, keepdims=True) + b3  # (TB, 1)

    # sigmoid: exp on EUP; approximate reciprocal also on EUP (no VALU divide).
    o_ref[...] = pl.reciprocal(1.0 + jnp.exp(-z), approx=True)


def _round_up(n, m):
    return ((n + m - 1) // m) * m


def simple_nn_forward(x, packed_params, *, block_b=1024):
    """x: (B, 2) f32; packed_params: (16, 128) f32 slab from pack_params()."""
    B = x.shape[0]
    # TB multiple of 128 (satisfies the (8,128) block rule and keeps lanes/sublanes
    # friendly); capped at block_b so double-buffered x tiles stay tiny vs VMEM.
    TB = min(block_b, _round_up(B, 128))
    Bp = _round_up(B, TB)
    if Bp != B:
        x = jnp.pad(x, ((0, Bp - B), (0, 0)))

    out = pl.pallas_call(
        mlp_kernel,
        out_shape=jax.ShapeDtypeStruct((Bp, 1), jnp.float32),
        grid=(Bp // TB,),
        in_specs=[
            pl.BlockSpec((TB, 2), lambda i: (i, 0)),                    # batch tile
            pl.BlockSpec((PARAM_ROWS, PARAM_COLS), lambda i: (0, 0)),   # invariant params
        ],
        out_specs=pl.BlockSpec((TB, 1), lambda i: (i, 0)),
        compiler_params=pltpu.CompilerParams(
            dimension_semantics=("parallel",)),  # v7x: shard batch tiles across 2 TCs
    )(x, packed_params)
    return out[:B]


def init_params(key):
    """Deterministic init mimicking nn.Linear default U[-1/sqrt(fan_in), +1/sqrt(fan_in)].
    Weights stored as (in_features, out_features) so the kernel computes x @ W + b,
    matching PyTorch's x @ W_pt.T + b."""
    def linear(key, fan_in, fan_out):
        kw, kb = jax.random.split(key)
        bound = 1.0 / jnp.sqrt(float(fan_in))
        w = jax.random.uniform(kw, (fan_in, fan_out), jnp.float32, -bound, bound)
        b = jax.random.uniform(kb, (1, fan_out), jnp.float32, -bound, bound)
        return w, b

    k1, k2, k3 = jax.random.split(key, 3)
    w1, b1 = linear(k1, 2, 10)
    w2, b2 = linear(k2, 10, 8)
    w3, b3 = linear(k3, 8, 1)
    return (w1, b1, w2, b2, w3, b3)


def pack_params(params):
    """Concatenate all weights/biases into one (16, 128) f32 slab (single DMA)."""
    w1, b1, w2, b2, w3, b3 = params
    buf = jnp.zeros((PARAM_ROWS, PARAM_COLS), jnp.float32)
    buf = buf.at[0:2, 0:10].set(w1)        # (2, 10)
    buf = buf.at[2:3, 0:10].set(b1)        # (1, 10)
    buf = buf.at[3:13, 0:8].set(w2)        # (10, 8)
    buf = buf.at[13:14, 0:8].set(b2)       # (1, 8)
    buf = buf.at[14:15, 0:8].set(w3.T)     # (1, 8)
    buf = buf.at[15:16, 0:1].set(b3)       # (1, 1)
    return buf


if __name__ == "__main__":
    key = jax.random.PRNGKey(0)
    k_params, k_x = jax.random.split(key)
    params = init_params(k_params)
    packed = pack_params(params)

    B = 256  # small demo batch; tiled as two 128-row blocks -> grid=(2,)
    x = jax.random.normal(k_x, (B, 2), dtype=jnp.float32)

    out = jax.block_until_ready(simple_nn_forward(x, packed))

    # Pure-JAX reference check.
    w1, b1, w2, b2, w3, b3 = params
    h = jnp.maximum(x @ w1 + b1, 0.0)
    h = jnp.maximum(h @ w2 + b2, 0.0)
    ref = jax.nn.sigmoid(h @ w3 + b3)
    assert out.shape == (B, 1)
    # Tolerance accounts for the EUP approximate reciprocal in the sigmoid.
    assert jnp.allclose(out, ref, atol=2e-3, rtol=2e-3), "mismatch vs reference"

    print("KERNEL_OK")
</pallas_src>

<mosaic_0001>
module attributes {stable_mosaic.version = 11 : i64} {
  func.func @mlp_kernel(%arg0: i32, %arg1: memref<256x2xf32, #tpu.memory_space<vmem>>, %arg2: memref<16x128xf32, #tpu.memory_space<vmem>>, %arg3: memref<256x1xf32, #tpu.memory_space<vmem>>) attributes {dimension_semantics = [#tpu.dimension_semantics<parallel>], iteration_bounds = array<i64: 1>, scalar_prefetch = 0 : i64, scratch_operands = 0 : i64, tpu.core_type = #tpu.core_type<tc>, window_params = [{transform_indices = @transform_0, window_bounds = array<i64: 256, 2>}, {pipeline_mode = #tpu.pipeline_mode<synchronous>, transform_indices = @transform_1, window_bounds = array<i64: 16, 128>}, {transform_indices = @transform_2, window_bounds = array<i64: 256, 1>}]} {
    %c0 = arith.constant 0 : index
    %c0_0 = arith.constant 0 : index
    %0 = vector.load %arg1[%c0, %c0_0] : memref<256x2xf32, #tpu.memory_space<vmem>>, vector<256x2xf32>
    %c0_1 = arith.constant 0 : index
    %c0_2 = arith.constant 0 : index
    %1 = vector.load %arg2[%c0_1, %c0_2] : memref<16x128xf32, #tpu.memory_space<vmem>>, vector<16x128xf32>
    %2 = vector.extract_strided_slice %1 {offsets = [0, 0], sizes = [1, 10], strides = [1, 1]} : vector<16x128xf32> to vector<1x10xf32>
    %3 = vector.extract_strided_slice %1 {offsets = [1, 0], sizes = [1, 10], strides = [1, 1]} : vector<16x128xf32> to vector<1x10xf32>
    %4 = vector.extract_strided_slice %1 {offsets = [2, 0], sizes = [1, 10], strides = [1, 1]} : vector<16x128xf32> to vector<1x10xf32>
    %5 = vector.extract_strided_slice %1 {offsets = [3, 0], sizes = [10, 8], strides = [1, 1]} : vector<16x128xf32> to vector<10x8xf32>
    %6 = vector.extract_strided_slice %1 {offsets = [13, 0], sizes = [1, 8], strides = [1, 1]} : vector<16x128xf32> to vector<1x8xf32>
    %7 = vector.extract_strided_slice %1 {offsets = [14, 0], sizes = [1, 8], strides = [1, 1]} : vector<16x128xf32> to vector<1x8xf32>
    %8 = vector.extract_strided_slice %1 {offsets = [15, 0], sizes = [1, 1], strides = [1, 1]} : vector<16x128xf32> to vector<1x1xf32>
    %9 = vector.extract_strided_slice %0 {offsets = [0, 0], sizes = [256, 1], strides = [1, 1]} : vector<256x2xf32> to vector<256x1xf32>
    %10 = vector.broadcast %9 : vector<256x1xf32> to vector<256x10xf32>
    %11 = vector.broadcast %2 : vector<1x10xf32> to vector<256x10xf32>
    %12 = arith.mulf %10, %11 : vector<256x10xf32>
    %13 = vector.extract_strided_slice %0 {offsets = [0, 1], sizes = [256, 1], strides = [1, 1]} : vector<256x2xf32> to vector<256x1xf32>
    %14 = vector.broadcast %13 : vector<256x1xf32> to vector<256x10xf32>
    %15 = vector.broadcast %3 : vector<1x10xf32> to vector<256x10xf32>
    %16 = arith.mulf %14, %15 : vector<256x10xf32>
    %17 = arith.addf %12, %16 : vector<256x10xf32>
    %18 = vector.broadcast %4 : vector<1x10xf32> to vector<256x10xf32>
    %19 = arith.addf %17, %18 : vector<256x10xf32>
    %cst = arith.constant 0.000000e+00 : f32
    %20 = vector.broadcast %cst : f32 to vector<256x10xf32>
    %21 = arith.maximumf %19, %20 : vector<256x10xf32>
    %cst_3 = arith.constant dense<0.000000e+00> : vector<256x8xf32>
    %22 = tpu.matmul %21, %5, %cst_3 {dimension_numbers = #tpu.dot_dimension_numbers<[1], [0], [0], [1], [0, 0, 1, 1], [], []>} : vector<256x10xf32>, vector<10x8xf32>, vector<256x8xf32> -> vector<256x8xf32>
    %23 = vector.broadcast %6 : vector<1x8xf32> to vector<256x8xf32>
    %24 = arith.addf %22, %23 : vector<256x8xf32>
    %cst_4 = arith.constant 0.000000e+00 : f32
    %25 = vector.broadcast %cst_4 : f32 to vector<256x8xf32>
    %26 = arith.maximumf %24, %25 : vector<256x8xf32>
    %27 = vector.broadcast %7 : vector<1x8xf32> to vector<256x8xf32>
    %28 = arith.mulf %26, %27 : vector<256x8xf32>
    %cst_5 = arith.constant dense<0.000000e+00> : vector<256xf32>
    %29 = vector.multi_reduction <add>, %28, %cst_5 [1] : vector<256x8xf32> to vector<256xf32>
    %30 = vector.shape_cast %29 : vector<256xf32> to vector<256x1xf32>
    %31 = vector.broadcast %8 : vector<1x1xf32> to vector<256x1xf32>
    %32 = arith.addf %30, %31 : vector<256x1xf32>
    %cst_6 = arith.constant 0.000000e+00 : f32
    %33 = vector.broadcast %cst_6 : f32 to vector<256x1xf32>
    %34 = arith.subf %33, %32 : vector<256x1xf32>
    %35 = math.exp %34 : vector<256x1xf32>
    %cst_7 = arith.constant 1.000000e+00 : f32
    %36 = vector.broadcast %cst_7 : f32 to vector<256x1xf32>
    %37 = arith.addf %36, %35 : vector<256x1xf32>
    %38 = tpu.reciprocal %37 {approx = true} : vector<256x1xf32> -> vector<256x1xf32>
    %c0_8 = arith.constant 0 : index
    %c0_9 = arith.constant 0 : index
    %39 = vector.load %arg3[%c0_8, %c0_9] : memref<256x1xf32, #tpu.memory_space<vmem>>, vector<256x1xf32>
    tpu.vector_store %arg3[%c0_8, %c0_9], %38 {strides = array<i32>} : memref<256x1xf32, #tpu.memory_space<vmem>>, vector<256x1xf32>,
    return
  }
  func.func @transform_0(%arg0: i32) -> (i32, i32) {
    %c0_i32 = arith.constant 0 : i32
    %c0_i32_0 = arith.constant 0 : i32
    return %arg0, %c0_i32 : i32, i32
  }
  func.func @transform_1(%arg0: i32) -> (i32, i32) {
    %c0_i32 = arith.constant 0 : i32
    %c0_i32_0 = arith.constant 0 : i32
    %c0_i32_1 = arith.constant 0 : i32
    return %c0_i32, %c0_i32_0 : i32, i32
  }
  func.func @transform_2(%arg0: i32) -> (i32, i32) {
    %c0_i32 = arith.constant 0 : i32
    %c0_i32_0 = arith.constant 0 : i32
    return %arg0, %c0_i32 : i32, i32
  }
}

</mosaic_0001>

<bundles_post_ra>
// kernel: tpu_custom_call.1
= control target key start
LH: loop header
LB: loop body
LE: loop exit
PB: predicated region body
PF: predicated region fallthrough
CT: control target
= control target key end

     0   :  { %v1284_v0 = vmov 0   ;;  %v1285_v33 = vmov 1   ;;  %vm601_vm0 = vcmask 1041408   ;;  %vm499_vm1 = vcmask 1044480   ;;  %s1957_s0 = inlined_call_operand.vmem [shape: f32[256,2], index: 0, kind: input, shape index: {}]   ;;  %s1958_s1 = inlined_call_operand.vmem [shape: f32[16,128], index: 1, kind: input, shape index: {}]   ;;  %s1959_s2 = inlined_call_operand.vmem [shape: f32[256,1], index: 2, kind: output, shape index: {}]  }
   0x1   :  { %1152 = vset.pattern.permute.xlu2 %v1284_v0  ;;  %1151 = vset.pattern.permute.xlu1 %v1284_v0  ;;  %v1304_v1 = vld [vmem:[%s1957_s0 + $0x20] sm:$0xff]  ;;  %v1309_v2 = vld [vmem:[%s1957_s0 + $0x10] sm:$0xff]  ;;  %v1322_v4 = vld [vmem:[%s1957_s0 + $0x28] sm:$0xff]  ;;  %vm504_vm2 = vcmask 80896   ;;  %vm782_vm3 = vcmask 64512   ;;  %vm1072_vm4 = vcmask 7168  }
   0x2   :  { %v1314_v3 = vld [vmem:[%s1957_s0] sm:$0xff]  ;;  %1150 = vset.pattern.permute.xlu0 %v1284_v0  ;;  %67 = vperm.xlu2 %1152, %v1304_v1   ;;  %v1327_v5 = vld [vmem:[%s1957_s0 + $0x18] sm:$0xff]  ;;  %v1332_v6 = vld [vmem:[%s1957_s0 + $0x8] sm:$0xff] }
   0x3   :  { %57 = vperm.xlu1 %1151, %v1309_v2   ;;  %47 = vperm.xlu0 %1150, %v1314_v3   ;;  %v19_v7 = vld [vmem:[%s1957_s0 + $0x40] sm:$0xff]  ;;  %v1343_v8 = vld [vmem:[%s1957_s0 + $0x38] sm:$0xff]  ;;  %v1348_v9 = vld [vmem:[%s1957_s0 + $0x30] sm:$0xff] }
   0x4   :  { %v1355_v10 = vld [vmem:[%s1957_s0 + $0x58] sm:$0xff]  ;;  %v21_v11 = vld [vmem:[%s1957_s0 + $0x50] sm:$0xff]  ;;  %v20_v12 = vld [vmem:[%s1957_s0 + $0x48] sm:$0xff] }
   0x5   :  { %v1367_v13 = vld [vmem:[%s1957_s0 + $0x70] sm:$0xff]  ;;  %v1372_v14 = vld [vmem:[%s1957_s0 + $0x68] sm:$0xff]  ;;  %v1377_v15 = vld [vmem:[%s1957_s0 + $0x60] sm:$0xff] }
   0x6   :  { %v28_v16 = vld [vmem:[%s1957_s0 + $0x88] sm:$0xff]  ;;  %v27_v17 = vld [vmem:[%s1957_s0 + $0x80] sm:$0xff]  ;;  %v1391_v18 = vld [vmem:[%s1957_s0 + $0x78] sm:$0xff] }
   0x7   :  { %v31_v19 = vld [vmem:[%s1957_s0 + $0xa0] sm:$0xff]  ;;  %v30_v20 = vld [vmem:[%s1957_s0 + $0x98] sm:$0xff]  ;;  %v29_v21 = vld [vmem:[%s1957_s0 + $0x90] sm:$0xff] }
   0x8   :  { %v1406_v22 = vld [vmem:[%s1957_s0 + $0xb8] sm:$0xff]  ;;  %v1411_v23 = vld [vmem:[%s1957_s0 + $0xb0] sm:$0xff]  ;;  %v32_v24 = vld [vmem:[%s1957_s0 + $0xa8] sm:$0xff] }
   0x9   :  { %v37_v25 = vld [vmem:[%s1957_s0 + $0xd0] sm:$0xff]  ;;  %v36_v26 = vld [vmem:[%s1957_s0 + $0xc8] sm:$0xff]  ;;  %v35_v27 = vld [vmem:[%s1957_s0 + $0xc0] sm:$0xff] }
   0xa   :  { %72 = vperm.xlu2 %1152, %v1322_v4   ;;  %v40_v28 = vld [vmem:[%s1957_s0 + $0xe8] sm:$0xff]  ;;  %v39_v29 = vld [vmem:[%s1957_s0 + $0xe0] sm:$0xff]  ;;  %v38_v30 = vld [vmem:[%s1957_s0 + $0xd8] sm:$0xff] }
   0xb   :  { %62 = vperm.xlu1 %1151, %v1327_v5   ;;  %52 = vperm.xlu0 %1150, %v1332_v6   ;;  %v1439_v31 = vld [vmem:[%s1957_s0 + $0xf8] sm:$0xff]  ;;  %v1444_v32 = vld [vmem:[%s1957_s0 + $0xf0] sm:$0xff]  ;;  %v1488_v49 = vld [vmem:[%s1958_s1 + $0x8] sm:$0xff] }
   0xc   :  { %v501_v50 = vrot.slane %v1488_v49, 3  ;;  %v43_v51 = vld [vmem:[%s1958_s1] sm:$0xff] }
   0xd   :  { %v500_v53 = vrot.slane %v43_v51, 3  ;;  %v1517_v63 = vperm.slane %v43_v51, 1  ;;  %v1520_v0 = vperm.slane %v43_v51, 0 }
   0xe   :  { %1143 = vmatpush.msk.msra.mxu2 %vm601_vm0, %v501_v50  ;;  %1142 = vmatpush.msk.msra.mxu1 %vm601_vm0, %v501_v50 }
   0xf   :  { %v502_v56 = vsel %vm499_vm1, %v500_v53, %v501_v50  ;;  %1109 = vmatpush.msk.msra.mxu0 %vm601_vm0, %v501_v50  ;;  %1144 = vmatpush.msk.msra.mxu3 %vm601_vm0, %v501_v50 }
  0x10   :  { %1146 = vmatpush.msra.mxu2 %v502_v56  ;;  %1145 = vmatpush.msra.mxu1 %v502_v56 }
  0x11   :  { %619 = vmatpush.msra.mxu0 %v502_v56  ;;  %1147 = vmatpush.msra.mxu3 %v502_v56 }
  0x12   :  { %87 = vperm.xlu2 %1152, %v19_v7  }
  0x13   :  { %82 = vperm.xlu1 %1151, %v1343_v8   ;;  %77 = vperm.xlu0 %1150, %v1348_v9  }
  0x1a   :  { %102 = vperm.xlu2 %1152, %v1355_v10  }
  0x1b   :  { %97 = vperm.xlu1 %1151, %v21_v11   ;;  %92 = vperm.xlu0 %1150, %v20_v12  }
  0x22   :  { %117 = vperm.xlu2 %1152, %v1367_v13  }
  0x23   :  { %112 = vperm.xlu1 %1151, %v1372_v14   ;;  %107 = vperm.xlu0 %1150, %v1377_v15  }
  0x2a   :  { %132 = vperm.xlu2 %1152, %v28_v16  }
  0x2b   :  { %127 = vperm.xlu1 %1151, %v27_v17   ;;  %122 = vperm.xlu0 %1150, %v1391_v18  }
  0x32   :  { %147 = vperm.xlu2 %1152, %v31_v19  }
  0x33   :  { %142 = vperm.xlu1 %1151, %v30_v20   ;;  %137 = vperm.xlu0 %1150, %v29_v21  }
  0x3a   :  { %162 = vperm.xlu2 %1152, %v1406_v22  }
  0x3b   :  { %157 = vperm.xlu1 %1151, %v1411_v23   ;;  %152 = vperm.xlu0 %1150, %v32_v24  }
  0x42   :  { %177 = vperm.xlu2 %1152, %v37_v25  }
  0x43   :  { %172 = vperm.xlu1 %1151, %v36_v26   ;;  %167 = vperm.xlu0 %1150, %v35_v27  }
  0x4a   :  { %192 = vperm.xlu2 %1152, %v40_v28  }
  0x4b   :  { %187 = vperm.xlu1 %1151, %v39_v29   ;;  %182 = vperm.xlu0 %1150, %v38_v30  }
  0x52   :  { %1153 = vset.pattern.permute.xlu2 %v1285_v33 }
  0x53   :  { %202 = vperm.xlu1 %1151, %v1439_v31   ;;  %197 = vperm.xlu0 %1150, %v1444_v32  }
  0x54   :  { %303 = vperm.xlu2 %1153, %v27_v17  }
  0x5b   :  { %1155 = vset.pattern.permute.xlu1 %v1285_v33  ;;  %1154 = vset.pattern.permute.xlu0 %v1285_v33 }
  0x5c   :  { %271 = vperm.xlu2 %1153, %v19_v7   ;;  %239 = vperm.xlu1 %1155, %v1314_v3   ;;  %v1449_v34 = vpop.permute.xlu2 %67 }
  0x5d   :  { %335 = vperm.xlu0 %1154, %v35_v27  }
  0x64   :  { %339 = vperm.xlu2 %1153, %v36_v26   ;;  %307 = vperm.xlu1 %1155, %v28_v16   ;;  %v1451_v35 = vpop.permute.xlu2 %72 }
  0x65   :  { %243 = vperm.xlu0 %1154, %v1332_v6   ;;  %v1528_v6 = vperm.slane %v43_v51, 2 }
  0x6c   :  { %311 = vperm.xlu2 %1153, %v29_v21   ;;  %275 = vperm.xlu1 %1155, %v20_v12   ;;  %v1454_v36 = vpop.permute.xlu2 %87 }
  0x6d   :  { %343 = vperm.xlu0 %1154, %v37_v25  }
  0x74   :  { %279 = vperm.xlu2 %1153, %v21_v11   ;;  %247 = vperm.xlu1 %1155, %v1309_v2   ;;  %v1457_v37 = vpop.permute.xlu2 %102 }
  0x75   :  { %315 = vperm.xlu0 %1154, %v30_v20   ;;  %v1459_v38 = vpop.permute.xlu1 %57  ;;  %v1461_v39 = vpop.permute.xlu0 %47 }
  0x76   :  { %v206_v25 = vmul.f32 %v1520_v0, %v1461_v39 }
  0x7c   :  { %251 = vperm.xlu2 %1153, %v1327_v5   ;;  %347 = vperm.xlu1 %1155, %v38_v30   ;;  %v1464_v40 = vpop.permute.xlu2 %117 }
  0x7d   :  { %283 = vperm.xlu0 %1154, %v1355_v10   ;;  %v1467_v41 = vpop.permute.xlu1 %62  ;;  %v1469_v42 = vpop.permute.xlu0 %52 }
  0x84   :  { %351 = vperm.xlu2 %1153, %v39_v29   ;;  %319 = vperm.xlu1 %1155, %v31_v19   ;;  %v1471_v43 = vpop.permute.xlu2 %132 }
  0x85   :  { %255 = vperm.xlu0 %1154, %v1304_v1   ;;  %v1474_v44 = vpop.permute.xlu1 %82  ;;  %v1476_v45 = vpop.permute.xlu0 %77 }
  0x8c   :  { %323 = vperm.xlu2 %1153, %v32_v24   ;;  %287 = vperm.xlu1 %1155, %v1377_v15   ;;  %v1479_v46 = vpop.permute.xlu2 %147 }
  0x8d   :  { %355 = vperm.xlu0 %1154, %v40_v28   ;;  %v1481_v47 = vpop.permute.xlu1 %97  ;;  %v1483_v48 = vpop.permute.xlu0 %92 }
  0x94   :  { %291 = vperm.xlu2 %1153, %v1372_v14   ;;  %259 = vperm.xlu1 %1155, %v1322_v4   ;;  %v1496_v52 = vpop.permute.xlu2 %162 }
  0x95   :  { %327 = vperm.xlu0 %1154, %v1411_v23   ;;  %v1499_v54 = vpop.permute.xlu1 %112  ;;  %v1501_v55 = vpop.permute.xlu0 %107 }
  0x9c   :  { %263 = vperm.xlu2 %1153, %v1348_v9   ;;  %359 = vperm.xlu1 %1155, %v1444_v32   ;;  %v1505_v57 = vpop.permute.xlu2 %177 }
  0x9d   :  { %295 = vperm.xlu0 %1154, %v1367_v13   ;;  %v128_v58 = vpop.permute.xlu1 %127  ;;  %v1508_v59 = vpop.permute.xlu0 %122  ;;  %v214_v13 = vmul.f32 %v1520_v0, %v1454_v36 }
  0x9e   :  { %v222_v4 = vmul.f32 %v1520_v0, %v128_v58 }
  0xa4   :  { %363 = vperm.xlu2 %1153, %v1439_v31   ;;  %331 = vperm.xlu1 %1155, %v1406_v22   ;;  %v1512_v60 = vpop.permute.xlu2 %192 }
  0xa5   :  { %267 = vperm.xlu0 %1154, %v1343_v8   ;;  %v1515_v61 = vpop.permute.xlu1 %142  ;;  %v138_v62 = vpop.permute.xlu0 %137 }
  0xac   :  { %299 = vperm.xlu1 %1155, %v1391_v18  }
  0xad   :  { %v1522_v1 = vpop.permute.xlu1 %157  ;;  %v1524_v2 = vpop.permute.xlu0 %152 }
  0xae   :  { %v304_v3 = vpop.permute.xlu2 %303 }
  0xaf   :  { %v383_v5 = vmul.f32 %v1517_v63, %v304_v3  ;;  %v223_v3 = vmul.f32 %v1520_v0, %v1471_v43  ;;  %v224_v43 = vmul.f32 %v1520_v0, %v138_v62  ;;  %v232_v62 = vmul.f32 %v1520_v0, %v1505_v57 }
  0xb1   :  { %v415_v7 = vadd.f32 %v383_v5, %v222_v4 }
  0xb3   :  { %v448_v8 = vadd.f32 %v1528_v6, %v415_v7  ;;  %v207_v7 = vmul.f32 %v1520_v0, %v1469_v42 }
  0xb5   :  { %v173_v9 = vpop.permute.xlu1 %172  ;;  %v168_v10 = vpop.permute.xlu0 %167  ;;  %v480_v11 = vmax.f32 %v448_v8, 0.0 }
  0xb6   :  { %v272_v12 = vpop.permute.xlu2 %271  ;;  %v230_v28 = vmul.f32 %v1520_v0, %v168_v10  ;;  %v231_v50 = vmul.f32 %v1520_v0, %v173_v9 }
  0xb7   :  { %v375_v14 = vmul.f32 %v1517_v63, %v272_v12  ;;  %1126 = vmatmul.msk.f32.vlgmr.msra.gmra.mxu2 %vm504_vm2, %v480_v11 }
  0xb9   :  { %v407_v15 = vadd.f32 %v375_v14, %v214_v13 }
  0xbb   :  { %v440_v16 = vadd.f32 %v1528_v6, %v407_v15 }
  0xbd   :  { %v1536_v17 = vpop.permute.xlu1 %187  ;;  %v1538_v18 = vpop.permute.xlu0 %182  ;;  %v472_v19 = vmax.f32 %v440_v16, 0.0 }
  0xbe   :  { %v340_v20 = vpop.permute.xlu2 %339 }
  0xbf   :  { %1118 = vmatmul.msk.f32.vlgmr.msra.gmra.mxu1 %vm504_vm2, %v472_v19  ;;  %v392_v31 = vmul.f32 %v1517_v63, %v340_v20 }
  0xc1   :  { %v424_v39 = vadd.f32 %v392_v31, %v231_v50  ;;  %v216_v31 = vmul.f32 %v1520_v0, %v1481_v47  ;;  %v225_v47 = vmul.f32 %v1520_v0, %v1515_v61 }
  0xc3   :  { %v457_v12 = vadd.f32 %v1528_v6, %v424_v39 }
  0xc5   :  { %v1541_v21 = vpop.permute.xlu1 %202  ;;  %v1543_v22 = vpop.permute.xlu0 %197 }
  0xc6   :  { %v312_v23 = vpop.permute.xlu2 %311 }
  0xc7   :  { %v385_v9 = vmul.f32 %v1517_v63, %v312_v23 }
  0xc9   :  { %v417_v16 = vadd.f32 %v385_v9, %v224_v43  ;;  %v209_v9 = vmul.f32 %v1520_v0, %v1467_v41  ;;  %v217_v41 = vmul.f32 %v1520_v0, %v1457_v37 }
  0xce   :  { %v240_v24 = vpop.permute.xlu1 %239  ;;  %v280_v32 = vpop.permute.xlu2 %279 }
  0xcf   :  { %v367_v26 = vmul.f32 %v1517_v63, %v240_v24  ;;  %v336_v27 = vpop.permute.xlu0 %335  ;;  %v489_v24 = vmax.f32 %v457_v12, 0.0 }
  0xd0   :  { %v391_v29 = vmul.f32 %v1517_v63, %v336_v27 }
  0xd1   :  { %v399_v30 = vadd.f32 %v367_v26, %v206_v25  ;;  %v215_v25 = vmul.f32 %v1520_v0, %v1483_v48 }
  0xd2   :  { %v423_v33 = vadd.f32 %v391_v29, %v230_v28  ;;  %v377_v28 = vmul.f32 %v1517_v63, %v280_v32  ;;  %v208_v32 = vmul.f32 %v1520_v0, %v1459_v38 }
  0xd3   :  { %v432_v36 = vadd.f32 %v1528_v6, %v399_v30  ;;  %v450_v30 = vadd.f32 %v1528_v6, %v417_v16  ;;  %v233_v16 = vmul.f32 %v1520_v0, %v1538_v18 }
  0xd4   :  { %v456_v51 = vadd.f32 %v1528_v6, %v423_v33  ;;  %v409_v57 = vadd.f32 %v377_v28, %v216_v31  ;;  %v226_v31 = vmul.f32 %v1520_v0, %v1479_v46 }
  0xd5   :  { %v464_v53 = vmax.f32 %v432_v36, 0.0 }
  0xd6   :  { %v308_v56 = vpop.permute.xlu1 %307  ;;  %v488_v58 = vmax.f32 %v456_v51, 0.0  ;;  %v252_v14 = vpop.permute.xlu2 %251  ;;  %v482_v51 = vmax.f32 %v450_v30, 0.0 }
  0xd7   :  { %v384_v4 = vmul.f32 %v1517_v63, %v308_v56  ;;  %v244_v5 = vpop.permute.xlu0 %243  ;;  %1110 = vmatmul.msk.f32.vlgmr.msra.gmra.mxu0 %vm504_vm2, %v464_v53 }
  0xd8   :  { %v368_v8 = vmul.f32 %v1517_v63, %v244_v5  ;;  %1134 = vmatmul.msk.f32.vlgmr.msra.gmra.mxu3 %vm504_vm2, %v488_v58  ;;  %v370_v5 = vmul.f32 %v1517_v63, %v252_v14 }
  0xd9   :  { %v416_v10 = vadd.f32 %v384_v4, %v223_v3 }
  0xda   :  { %v400_v11 = vadd.f32 %v368_v8, %v207_v7  ;;  %v442_v8 = vadd.f32 %v1528_v6, %v409_v57  ;;  %v402_v12 = vadd.f32 %v370_v5, %v209_v9 }
  0xdb   :  { %v449_v13 = vadd.f32 %v1528_v6, %v416_v10 }
  0xdc   :  { %v433_v15 = vadd.f32 %v1528_v6, %v400_v11  ;;  %v474_v61 = vmax.f32 %v442_v8, 0.0  ;;  %v435_v18 = vadd.f32 %v1528_v6, %v402_v12 }
  0xdd   :  { %v481_v19 = vmax.f32 %v449_v13, 0.0 }
  0xde   :  { %v276_v42 = vpop.permute.xlu1 %275  ;;  %v465_v20 = vmax.f32 %v433_v15, 0.0  ;;  %v352_v53 = vpop.permute.xlu2 %351  ;;  %v467_v37 = vmax.f32 %v435_v18, 0.0 }
  0xdf   :  { %v376_v23 = vmul.f32 %v1517_v63, %v276_v42  ;;  %v344_v26 = vpop.permute.xlu0 %343  ;;  %1127 = vmatmul.msk.f32.gmra.mxu2 %vm504_vm2, %v481_v19 }
  0xe0   :  { %v393_v27 = vmul.f32 %v1517_v63, %v344_v26  ;;  %1111 = vmatmul.msk.f32.gmra.mxu0 %vm504_vm2, %v465_v20  ;;  %1135 = vmatmul.msk.f32.gmra.mxu3 %vm504_vm2, %v489_v24  ;;  %v395_v24 = vmul.f32 %v1517_v63, %v352_v53  ;;  %v234_v26 = vmul.f32 %v1520_v0, %v1536_v17 }
  0xe1   :  { %v408_v29 = vadd.f32 %v376_v23, %v215_v25  ;;  %v210_v17 = vmul.f32 %v1520_v0, %v1449_v34 }
  0xe2   :  { %v425_v48 = vadd.f32 %v393_v27, %v232_v62  ;;  %v427_v28 = vadd.f32 %v395_v24, %v234_v26 }
  0xe3   :  { %v441_v33 = vadd.f32 %v1528_v6, %v408_v29 }
  0xe4   :  { %v458_v36 = vadd.f32 %v1528_v6, %v425_v48  ;;  %v460_v53 = vadd.f32 %v1528_v6, %v427_v28 }
  0xe5   :  { %v473_v50 = vmax.f32 %v441_v33, 0.0 }
  0xe6   :  { %v248_v39 = vpop.permute.xlu1 %247  ;;  %v490_v56 = vmax.f32 %v458_v36, 0.0  ;;  %v324_v42 = vpop.permute.xlu2 %323 }
  0xe7   :  { %v369_v58 = vmul.f32 %v1517_v63, %v248_v39  ;;  %v316_v3 = vpop.permute.xlu0 %315  ;;  %1119 = vmatmul.msk.f32.gmra.mxu1 %vm504_vm2, %v473_v50  ;;  %1128 = vmatmul.msk.f32.gmra.mxu2 %vm504_vm2, %v482_v51  ;;  %v388_v50 = vmul.f32 %v1517_v63, %v324_v42  ;;  %v211_v42 = vmul.f32 %v1520_v0, %v1451_v35 }
  0xe8   :  { %v386_v4 = vmul.f32 %v1517_v63, %v316_v3  ;;  %1136 = vmatmul.msk.f32.gmra.mxu3 %vm504_vm2, %v490_v56  ;;  %v227_v56 = vmul.f32 %v1520_v0, %v1524_v2  ;;  %v235_v2 = vmul.f32 %v1520_v0, %v1512_v60 }
  0xe9   :  { %v401_v7 = vadd.f32 %v369_v58, %v208_v32 }
  0xea   :  { %v418_v38 = vadd.f32 %v386_v4, %v225_v47  ;;  %v420_v3 = vadd.f32 %v388_v50, %v227_v56  ;;  %v492_v47 = vmax.f32 %v460_v53, 0.0 }
  0xeb   :  { %v434_v10 = vadd.f32 %v1528_v6, %v401_v7  ;;  %v218_v7 = vmul.f32 %v1520_v0, %v1501_v55 }
  0xec   :  { %v451_v11 = vadd.f32 %v1528_v6, %v418_v38  ;;  %v453_v12 = vadd.f32 %v1528_v6, %v420_v3 }
  0xed   :  { %v466_v43 = vmax.f32 %v434_v10, 0.0 }
  0xee   :  { %v348_v13 = vpop.permute.xlu1 %347  ;;  %v483_v15 = vmax.f32 %v451_v11, 0.0  ;;  %v292_v46 = vpop.permute.xlu2 %291 }
  0xef   :  { %v394_v14 = vmul.f32 %v1517_v63, %v348_v13  ;;  %v284_v19 = vpop.permute.xlu0 %283  ;;  %1112 = vmatmul.msk.f32.gmra.mxu0 %vm504_vm2, %v466_v43  ;;  %1120 = vmatmul.msk.f32.gmra.mxu1 %vm504_vm2, %v474_v61  ;;  %v380_v10 = vmul.f32 %v1517_v63, %v292_v46  ;;  %v219_v43 = vmul.f32 %v1520_v0, %v1499_v54 }
  0xf0   :  { %v378_v20 = vmul.f32 %v1517_v63, %v284_v19  ;;  %1129 = vmatmul.msk.f32.gmra.mxu2 %vm504_vm2, %v483_v15  ;;  %v228_v54 = vmul.f32 %v1520_v0, %v1522_v1  ;;  %v237_v46 = vmul.f32 %v1520_v0, %v1541_v21  ;;  %v213_v21 = vmul.f32 %v1520_v0, %v1474_v44 }
  0xf1   :  { %v426_v25 = vadd.f32 %v394_v14, %v233_v16  ;;  %v412_v16 = vadd.f32 %v380_v10, %v219_v43  ;;  %v485_v14 = vmax.f32 %v453_v12, 0.0  ;;  %v221_v43 = vmul.f32 %v1520_v0, %v1508_v59 }
  0xf2   :  { %v410_v23 = vadd.f32 %v378_v20, %v217_v41 }
  0xf3   :  { %v459_v62 = vadd.f32 %v1528_v6, %v426_v25  ;;  %v445_v26 = vadd.f32 %v1528_v6, %v412_v16  ;;  %v1693_v16 = vperm.slane %v1488_v49, 5 }
  0xf4   :  { %v443_v27 = vadd.f32 %v1528_v6, %v410_v23 }
  0xf5   :  { %v491_v29 = vmax.f32 %v459_v62, 0.0  ;;  %v212_v62 = vmul.f32 %v1520_v0, %v1476_v45  ;;  %v477_v1 = vmax.f32 %v445_v26, 0.0  ;;  %v220_v45 = vmul.f32 %v1520_v0, %v1464_v40 }
  0xf6   :  { %v320_v30 = vpop.permute.xlu1 %319  ;;  %v475_v48 = vmax.f32 %v443_v27, 0.0  ;;  %v264_v13 = vpop.permute.xlu2 %263 }
  0xf7   :  { %v387_v33 = vmul.f32 %v1517_v63, %v320_v30  ;;  %v256_v36 = vpop.permute.xlu0 %255  ;;  %1113 = vmatmul.msk.f32.gmra.mxu0 %vm504_vm2, %v467_v37  ;;  %1137 = vmatmul.msk.f32.gmra.mxu3 %vm504_vm2, %v491_v29  ;;  %v373_v18 = vmul.f32 %v1517_v63, %v264_v13 }
  0xf8   :  { %v371_v57 = vmul.f32 %v1517_v63, %v256_v36  ;;  %1121 = vmatmul.msk.f32.gmra.mxu1 %vm504_vm2, %v475_v48 }
  0xf9   :  { %v419_v51 = vadd.f32 %v387_v33, %v226_v31  ;;  %v405_v37 = vadd.f32 %v373_v18, %v212_v62  ;;  %v236_v33 = vmul.f32 %v1520_v0, %v1543_v22 }
  0xfa   :  { %v403_v39 = vadd.f32 %v371_v57, %v210_v17 }
  0xfb   :  { %v452_v32 = vadd.f32 %v1528_v6, %v419_v51  ;;  %v438_v53 = vadd.f32 %v1528_v6, %v405_v37 }
  0xfc   :  { %v436_v58 = vadd.f32 %v1528_v6, %v403_v39 }
  0xfd   :  { %v484_v34 = vmax.f32 %v452_v32, 0.0 }
  0xfe   :  { %v288_v4 = vpop.permute.xlu1 %287  ;;  %v468_v5 = vmax.f32 %v436_v58, 0.0  ;;  %v364_v30 = vpop.permute.xlu2 %363  ;;  %v470_v58 = vmax.f32 %v438_v53, 0.0 }
  0xff   :  { %v379_v8 = vmul.f32 %v1517_v63, %v288_v4  ;;  %v356_v38 = vpop.permute.xlu0 %355  ;;  %1130 = vmatmul.msk.f32.gmra.mxu2 %vm504_vm2, %v484_v34  ;;  %1138 = vmatmul.msk.f32.gmra.mxu3 %vm504_vm2, %v492_v47  ;;  %v398_v50 = vmul.f32 %v1517_v63, %v364_v30  ;;  %v229_v47 = vmul.f32 %v1520_v0, %v1496_v52 }
 0x100   :  { %v396_v9 = vmul.f32 %v1517_v63, %v356_v38  ;;  %1114 = vmatmul.msk.f32.gmra.mxu0 %vm504_vm2, %v468_v5 }
 0x101   :  { %v411_v11 = vadd.f32 %v379_v8, %v218_v7  ;;  %v430_v32 = vadd.f32 %v398_v50, %v237_v46 }
 0x102   :  { %v428_v55 = vadd.f32 %v396_v9, %v235_v2 }
 0x103   :  { %v444_v61 = vadd.f32 %v1528_v6, %v411_v11  ;;  %v463_v38 = vadd.f32 %v1528_v6, %v430_v32 }
 0x104   :  { %v461_v15 = vadd.f32 %v1528_v6, %v428_v55 }
 0x105   :  { %v476_v60 = vmax.f32 %v444_v61, 0.0  ;;  %v495_v11 = vmax.f32 %v463_v38, 0.0 }
 0x106   :  { %v260_v19 = vpop.permute.xlu1 %259  ;;  %v493_v41 = vmax.f32 %v461_v15, 0.0 }
 0x107   :  { %v372_v20 = vmul.f32 %v1517_v63, %v260_v19  ;;  %v328_v24 = vpop.permute.xlu0 %327  ;;  %1122 = vmatmul.msk.f32.gmra.mxu1 %vm504_vm2, %v476_v60  ;;  %1131 = vmatmul.msk.f32.gmra.mxu2 %vm504_vm2, %v485_v14 }
 0x108   :  { %v389_v25 = vmul.f32 %v1517_v63, %v328_v24  ;;  %1139 = vmatmul.msk.f32.gmra.mxu3 %vm504_vm2, %v493_v41 }
 0x109   :  { %v404_v23 = vadd.f32 %v372_v20, %v211_v42 }
 0x10a   :  { %v421_v35 = vadd.f32 %v389_v25, %v228_v54 }
 0x10b   :  { %v437_v27 = vadd.f32 %v1528_v6, %v404_v23 }
 0x10c   :  { %v454_v28 = vadd.f32 %v1528_v6, %v421_v35 }
 0x10d   :  { %v469_v29 = vmax.f32 %v437_v27, 0.0 }
 0x10e   :  { %v360_v48 = vpop.permute.xlu1 %359  ;;  %v486_v31 = vmax.f32 %v454_v28, 0.0 }
 0x10f   :  { %v397_v36 = vmul.f32 %v1517_v63, %v360_v48  ;;  %v296_v17 = vpop.permute.xlu0 %295  ;;  %1115 = vmatmul.msk.f32.gmra.mxu0 %vm504_vm2, %v469_v29  ;;  %1123 = vmatmul.msk.f32.gmra.mxu1 %vm504_vm2, %v477_v1 }
 0x110   :  { %v381_v57 = vmul.f32 %v1517_v63, %v296_v17  ;;  %1132 = vmatmul.msk.f32.gmra.mxu2 %vm504_vm2, %v486_v31 }
 0x111   :  { %v429_v51 = vadd.f32 %v397_v36, %v236_v33 }
 0x112   :  { %v413_v22 = vadd.f32 %v381_v57, %v220_v45 }
 0x113   :  { %v462_v39 = vadd.f32 %v1528_v6, %v429_v51 }
 0x114   :  { %v446_v56 = vadd.f32 %v1528_v6, %v413_v22 }
 0x115   :  { %v494_v40 = vmax.f32 %v462_v39, 0.0 }
 0x116   :  { %v332_v3 = vpop.permute.xlu1 %331  ;;  %v478_v34 = vmax.f32 %v446_v56, 0.0 }
 0x117   :  { %v390_v4 = vmul.f32 %v1517_v63, %v332_v3  ;;  %v268_v5 = vpop.permute.xlu0 %267  ;;  %1116 = vmatmul.msk.f32.gmra.mxu0 %vm504_vm2, %v470_v58  ;;  %1140 = vmatmul.msk.f32.gmra.mxu3 %vm504_vm2, %v494_v40 }
 0x118   :  { %v374_v7 = vmul.f32 %v1517_v63, %v268_v5  ;;  %1124 = vmatmul.msk.f32.gmra.mxu1 %vm504_vm2, %v478_v34 }
 0x119   :  { %v422_v8 = vadd.f32 %v390_v4, %v229_v47 }
 0x11a   :  { %v406_v2 = vadd.f32 %v374_v7, %v213_v21 }
 0x11b   :  { %v455_v52 = vadd.f32 %v1528_v6, %v422_v8 }
 0x11c   :  { %v439_v9 = vadd.f32 %v1528_v6, %v406_v2 }
 0x11d   :  { %v487_v10 = vmax.f32 %v455_v52, 0.0 }
 0x11e   :  { %v300_v12 = vpop.permute.xlu1 %299  ;;  %v471_v55 = vmax.f32 %v439_v9, 0.0 }
 0x11f   :  { %v382_v44 = vmul.f32 %v1517_v63, %v300_v12  ;;  %1133 = vmatmul.msk.f32.gmra.mxu2 %vm504_vm2, %v487_v10  ;;  %1141 = vmatmul.msk.f32.gmra.mxu3 %vm504_vm2, %v495_v11  ;;  %v1697_v63 = vperm.slane %v1488_v49, 6 }
 0x120   :  { %1117 = vmatmul.msk.f32.gmra.mxu0 %vm504_vm2, %v471_v55 }
 0x121   :  { %v414_v61 = vadd.f32 %v382_v44, %v221_v43 }
 0x123   :  { %v447_v13 = vadd.f32 %v1528_v6, %v414_v61 }
 0x125   :  { %v479_v15 = vmax.f32 %v447_v13, 0.0 }
 0x127   :  { %1125 = vmatmul.msk.f32.gmra.mxu1 %vm504_vm2, %v479_v15 }
 0x13a   :  { %v669_v6 = vpop.f32.mrf.mxu2 }
 0x13b   :  { %v670_v20 = vadd.f32 %v669_v6, %v1693_v16 }
 0x13c   :  { %v645_v60 = vpop.f32.mrf.mxu1 }
 0x13d   :  { %v646_v59 = vadd.f32 %v645_v60, %v1693_v16  ;;  %v733_v25 = vmax.f32 %v670_v20, 0.0 }
 0x13f   :  { %v725_v0 = vmax.f32 %v646_v59, 0.0  ;;  %v766_v28 = vmul.f32 %v1697_v63, %v733_v25 }
 0x141   :  { %v758_v14 = vmul.f32 %v1697_v63, %v725_v0  ;;  %v831_v36 = vsel %vm782_vm3, %v766_v28, 0.0 }
 0x143   :  { %v807_v19 = vsel %vm782_vm3, %v758_v14, 0.0 }
 0x144   :  { %808 = vadd.xlane.f32.xlu0 %v807_v19 }
 0x154   :  { %v621_v41 = vpop.f32.mrf.mxu0 }
 0x155   :  { %v622_v42 = vadd.f32 %v621_v41, %v1693_v16 }
 0x157   :  { %v717_v24 = vmax.f32 %v622_v42, 0.0 }
 0x159   :  { %v750_v54 = vmul.f32 %v1697_v63, %v717_v24 }
 0x15b   :  { %v693_v18 = vpop.f32.mrf.mxu3  ;;  %v783_v23 = vsel %vm782_vm3, %v750_v54, 0.0 }
 0x15c   :  { %v694_v26 = vadd.f32 %v693_v18, %v1693_v16  ;;  %784 = vadd.xlane.f32.xlu2 %v783_v23 }
 0x15d   :  { %v624_v35 = vpop.f32.mrf.mxu0 }
 0x15e   :  { %v741_v62 = vmax.f32 %v694_v26, 0.0  ;;  %v625_v27 = vadd.f32 %v624_v35, %v1693_v16 }
 0x160   :  { %v718_v37 = vmax.f32 %v625_v27, 0.0  ;;  %v774_v29 = vmul.f32 %v1697_v63, %v741_v62 }
 0x162   :  { %v672_v1 = vpop.f32.mrf.mxu2  ;;  %v855_v30 = vsel %vm782_vm3, %v774_v29, 0.0  ;;  %v751_v48 = vmul.f32 %v1697_v63, %v718_v37 }
 0x163   :  { %v673_v31 = vadd.f32 %v672_v1, %v1693_v16  ;;  %v696_v33 = vpop.f32.mrf.mxu3  ;;  %856 = vadd.xlane.f32.xlu1 %v855_v30 }
 0x164   :  { %v697_v17 = vadd.f32 %v696_v33, %v1693_v16  ;;  %832 = vadd.xlane.f32.xlu2 %v831_v36  ;;  %v648_v45 = vpop.f32.mrf.mxu1  ;;  %v786_v57 = vsel %vm782_vm3, %v751_v48, 0.0 }
 0x165   :  { %v734_v50 = vmax.f32 %v673_v31, 0.0  ;;  %v649_v51 = vadd.f32 %v648_v45, %v1693_v16  ;;  %787 = vadd.xlane.f32.xlu0 %v786_v57 }
 0x166   :  { %v742_v53 = vmax.f32 %v697_v17, 0.0 }
 0x167   :  { %v726_v22 = vmax.f32 %v649_v51, 0.0  ;;  %v767_v39 = vmul.f32 %v1697_v63, %v734_v50 }
 0x168   :  { %v775_v46 = vmul.f32 %v1697_v63, %v742_v53 }
 0x169   :  { %v759_v56 = vmul.f32 %v1697_v63, %v726_v22  ;;  %v834_v5 = vsel %vm782_vm3, %v767_v39, 0.0 }
 0x16a   :  { %v675_v32 = vpop.f32.mrf.mxu2  ;;  %v858_v40 = vsel %vm782_vm3, %v775_v46, 0.0 }
 0x16b   :  { %v699_v58 = vpop.f32.mrf.mxu3  ;;  %v810_v3 = vsel %vm782_vm3, %v759_v56, 0.0  ;;  %v676_v38 = vadd.f32 %v675_v32, %v1693_v16 }
 0x16c   :  { %v700_v34 = vadd.f32 %v699_v58, %v1693_v16  ;;  %v651_v47 = vpop.f32.mrf.mxu1  ;;  %859 = vadd.xlane.f32.xlu2 %v858_v40  ;;  %811 = vadd.xlane.f32.xlu1 %v810_v3  ;;  %v627_v4 = vpop.f32.mrf.mxu0 }
 0x16d   :  { %v652_v21 = vadd.f32 %v651_v47, %v1693_v16  ;;  %v628_v7 = vadd.f32 %v627_v4, %v1693_v16  ;;  %835 = vadd.xlane.f32.xlu0 %v834_v5  ;;  %v735_v12 = vmax.f32 %v676_v38, 0.0 }
 0x16e   :  { %v743_v8 = vmax.f32 %v700_v34, 0.0 }
 0x16f   :  { %v727_v2 = vmax.f32 %v652_v21, 0.0  ;;  %v719_v52 = vmax.f32 %v628_v7, 0.0  ;;  %v768_v19 = vmul.f32 %v1697_v63, %v735_v12 }
 0x170   :  { %v776_v9 = vmul.f32 %v1697_v63, %v743_v8 }
 0x171   :  { %v760_v10 = vmul.f32 %v1697_v63, %v727_v2  ;;  %v752_v11 = vmul.f32 %v1697_v63, %v719_v52  ;;  %v837_v18 = vsel %vm782_vm3, %v768_v19, 0.0 }
 0x172   :  { %v861_v13 = vsel %vm782_vm3, %v776_v9, 0.0 }
 0x173   :  { %v813_v55 = vsel %vm782_vm3, %v760_v10, 0.0  ;;  %v789_v43 = vsel %vm782_vm3, %v752_v11, 0.0  ;;  %v678_v44 = vpop.f32.mrf.mxu2 }
 0x174   :  { %814 = vadd.xlane.f32.xlu2 %v813_v55  ;;  %v630_v61 = vpop.f32.mrf.mxu0  ;;  %790 = vadd.xlane.f32.xlu1 %v789_v43  ;;  %v679_v0 = vadd.f32 %v678_v44, %v1693_v16 }
 0x175   :  { %v631_v15 = vadd.f32 %v630_v61, %v1693_v16  ;;  %862 = vadd.xlane.f32.xlu0 %v861_v13  ;;  %v654_v60 = vpop.f32.mrf.mxu1 }
 0x176   :  { %v655_v59 = vadd.f32 %v654_v60, %v1693_v16  ;;  %v736_v24 = vmax.f32 %v679_v0, 0.0 }
 0x177   :  { %v720_v14 = vmax.f32 %v631_v15, 0.0 }
 0x178   :  { %v728_v6 = vmax.f32 %v655_v59, 0.0  ;;  %v769_v28 = vmul.f32 %v1697_v63, %v736_v24 }
 0x179   :  { %v753_v41 = vmul.f32 %v1697_v63, %v720_v14 }
 0x17a   :  { %v702_v42 = vpop.f32.mrf.mxu3  ;;  %v761_v20 = vmul.f32 %v1697_v63, %v728_v6  ;;  %v840_v48 = vsel %vm782_vm3, %v769_v28, 0.0 }
 0x17b   :  { %v703_v54 = vadd.f32 %v702_v42, %v1693_v16  ;;  %v792_v25 = vsel %vm782_vm3, %v753_v41, 0.0 }
 0x17c   :  { %793 = vadd.xlane.f32.xlu2 %v792_v25  ;;  %838 = vadd.xlane.f32.xlu1 %v837_v18  ;;  %v816_v23 = vsel %vm782_vm3, %v761_v20, 0.0 }
 0x17d   :  { %v744_v26 = vmax.f32 %v703_v54, 0.0  ;;  %817 = vadd.xlane.f32.xlu0 %v816_v23  ;;  %v633_v35 = vpop.f32.mrf.mxu0 }
 0x17e   :  { %v634_v62 = vadd.f32 %v633_v35, %v1693_v16 }
 0x17f   :  { %v777_v27 = vmul.f32 %v1697_v63, %v744_v26 }
 0x180   :  { %v721_v29 = vmax.f32 %v634_v62, 0.0 }
 0x181   :  { %v864_v30 = vsel %vm782_vm3, %v777_v27, 0.0 }
 0x182   :  { %v681_v37 = vpop.f32.mrf.mxu2  ;;  %v705_v36 = vpop.f32.mrf.mxu3  ;;  %v754_v50 = vmul.f32 %v1697_v63, %v721_v29 }
 0x183   :  { %v682_v1 = vadd.f32 %v681_v37, %v1693_v16  ;;  %v706_v51 = vadd.f32 %v705_v36, %v1693_v16 }
 0x184   :  { %865 = vadd.xlane.f32.xlu1 %v864_v30  ;;  %841 = vadd.xlane.f32.xlu2 %v840_v48  ;;  %v657_v31 = vpop.f32.mrf.mxu1  ;;  %v795_v32 = vsel %vm782_vm3, %v754_v50, 0.0 }
 0x185   :  { %v737_v33 = vmax.f32 %v682_v1, 0.0  ;;  %v658_v17 = vadd.f32 %v657_v31, %v1693_v16  ;;  %v745_v58 = vmax.f32 %v706_v51, 0.0 }
 0x187   :  { %v729_v45 = vmax.f32 %v658_v17, 0.0  ;;  %v770_v57 = vmul.f32 %v1697_v63, %v737_v33  ;;  %v778_v7 = vmul.f32 %v1697_v63, %v745_v58 }
 0x189   :  { %v843_v53 = vsel %vm782_vm3, %v770_v57, 0.0  ;;  %v762_v22 = vmul.f32 %v1697_v63, %v729_v45  ;;  %v867_v11 = vsel %vm782_vm3, %v778_v7, 0.0 }
 0x18a   :  { %v684_v46 = vpop.f32.mrf.mxu2  ;;  %844 = vadd.xlane.f32.xlu0 %v843_v53 }
 0x18b   :  { %v685_v39 = vadd.f32 %v684_v46, %v1693_v16  ;;  %v819_v56 = vsel %vm782_vm3, %v762_v22, 0.0  ;;  %v708_v38 = vpop.f32.mrf.mxu3 }
 0x18c   :  { %v660_v40 = vpop.f32.mrf.mxu1  ;;  %820 = vadd.xlane.f32.xlu1 %v819_v56  ;;  %v636_v3 = vpop.f32.mrf.mxu0  ;;  %796 = vadd.xlane.f32.xlu2 %v795_v32  ;;  %v709_v62 = vadd.f32 %v708_v38, %v1693_v16  ;;  %v1794_v56 = vperm.slane %v1488_v49, 7 }
 0x18d   :  { %v738_v34 = vmax.f32 %v685_v39, 0.0  ;;  %v637_v47 = vadd.f32 %v636_v3, %v1693_v16  ;;  %v661_v21 = vadd.f32 %v660_v40, %v1693_v16 }
 0x18e   :  { %v746_v33 = vmax.f32 %v709_v62, 0.0 }
 0x18f   :  { %v722_v4 = vmax.f32 %v637_v47, 0.0  ;;  %v771_v5 = vmul.f32 %v1697_v63, %v738_v34  ;;  %v730_v9 = vmax.f32 %v661_v21, 0.0 }
 0x190   :  { %v779_v53 = vmul.f32 %v1697_v63, %v746_v33 }
 0x191   :  { %v755_v8 = vmul.f32 %v1697_v63, %v722_v4  ;;  %v846_v2 = vsel %vm782_vm3, %v771_v5, 0.0  ;;  %v763_v60 = vmul.f32 %v1697_v63, %v730_v9 }
 0x192   :  { %v870_v46 = vsel %vm782_vm3, %v779_v53, 0.0 }
 0x193   :  { %v798_v52 = vsel %vm782_vm3, %v755_v8, 0.0  ;;  %v687_v12 = vpop.f32.mrf.mxu2  ;;  %v822_v41 = vsel %vm782_vm3, %v763_v60, 0.0 }
 0x194   :  { %847 = vadd.xlane.f32.xlu1 %v846_v2  ;;  %v639_v10 = vpop.f32.mrf.mxu0  ;;  %799 = vadd.xlane.f32.xlu0 %v798_v52  ;;  %v688_v13 = vadd.f32 %v687_v12, %v1693_v16 }
 0x195   :  { %v640_v55 = vadd.f32 %v639_v10, %v1693_v16  ;;  %868 = vadd.xlane.f32.xlu2 %v867_v11  ;;  %v663_v43 = vpop.f32.mrf.mxu1 }
 0x196   :  { %v664_v44 = vadd.f32 %v663_v43, %v1693_v16  ;;  %v739_v6 = vmax.f32 %v688_v13, 0.0 }
 0x197   :  { %v723_v61 = vmax.f32 %v640_v55, 0.0 }
 0x198   :  { %v731_v15 = vmax.f32 %v664_v44, 0.0  ;;  %v772_v54 = vmul.f32 %v1697_v63, %v739_v6 }
 0x199   :  { %v756_v59 = vmul.f32 %v1697_v63, %v723_v61 }
 0x19a   :  { %v764_v0 = vmul.f32 %v1697_v63, %v731_v15  ;;  %v711_v14 = vpop.f32.mrf.mxu3  ;;  %v849_v26 = vsel %vm782_vm3, %v772_v54, 0.0 }
 0x19b   :  { %v801_v19 = vsel %vm782_vm3, %v756_v59, 0.0  ;;  %v712_v29 = vadd.f32 %v711_v14, %v1693_v16 }
 0x19c   :  { %802 = vadd.xlane.f32.xlu1 %v801_v19  ;;  %v825_v42 = vsel %vm782_vm3, %v764_v0, 0.0 }
 0x19d   :  { %823 = vadd.xlane.f32.xlu2 %v822_v41  ;;  %826 = vadd.xlane.f32.xlu0 %v825_v42  ;;  %v642_v20 = vpop.f32.mrf.mxu0  ;;  %v747_v45 = vmax.f32 %v712_v29, 0.0 }
 0x19e   :  { %v643_v24 = vadd.f32 %v642_v20, %v1693_v16 }
 0x1a0   :  { %v724_v23 = vmax.f32 %v643_v24, 0.0 }
 0x1a2   :  { %v690_v25 = vpop.f32.mrf.mxu2  ;;  %v714_v28 = vpop.f32.mrf.mxu3  ;;  %v757_v31 = vmul.f32 %v1697_v63, %v724_v23 }
 0x1a3   :  { %v691_v18 = vadd.f32 %v690_v25, %v1693_v16  ;;  %v715_v48 = vadd.f32 %v714_v28, %v1693_v16 }
 0x1a4   :  { %v666_v35 = vpop.f32.mrf.mxu1  ;;  %v804_v51 = vsel %vm782_vm3, %v757_v31, 0.0 }
 0x1a5   :  { %v740_v27 = vmax.f32 %v691_v18, 0.0  ;;  %850 = vadd.xlane.f32.xlu2 %v849_v26  ;;  %v667_v37 = vadd.f32 %v666_v35, %v1693_v16  ;;  %v748_v50 = vmax.f32 %v715_v48, 0.0  ;;  %v780_v16 = vmul.f32 %v1697_v63, %v747_v45 }
 0x1a7   :  { %v732_v1 = vmax.f32 %v667_v37, 0.0  ;;  %v773_v30 = vmul.f32 %v1697_v63, %v740_v27  ;;  %v781_v22 = vmul.f32 %v1697_v63, %v748_v50  ;;  %v873_v39 = vsel %vm782_vm3, %v780_v16, 0.0 }
 0x1a9   :  { %v852_v36 = vsel %vm782_vm3, %v773_v30, 0.0  ;;  %v765_v17 = vmul.f32 %v1697_v63, %v732_v1  ;;  %v876_v32 = vsel %vm782_vm3, %v781_v22, 0.0 }
 0x1aa   :  { %853 = vadd.xlane.f32.xlu0 %v852_v36 }
 0x1ab   :  { %v828_v57 = vsel %vm782_vm3, %v765_v17, 0.0 }
 0x1ac   :  { %829 = vadd.xlane.f32.xlu1 %v828_v57 }
 0x1ad   :  { %805 = vadd.xlane.f32.xlu2 %v804_v51 }
 0x1b2   :  { %871 = vadd.xlane.f32.xlu0 %v870_v46 }
 0x1b4   :  { %874 = vadd.xlane.f32.xlu1 %v873_v39 }
 0x1b5   :  { %877 = vadd.xlane.f32.xlu2 %v876_v32 }
 0x1b7   :  { %v809_v58 = vpop.xlane.xlu0 %808 }
 0x1b8   :  { %v888_v40 = vadd.f32 %v1794_v56, %v809_v58 }
 0x1ba   :  { %v920_v3 = vsub.f32 0.0, %v888_v40 }
 0x1bc   :  { %v960_v34 = vmul.f32 1.442695, %v920_v3 }
 0x1be   :  { %1156 = vpow2.f32 %v960_v34 }
 0x1c4   :  { %v1157_v47 = vpop.eup %1156 }
 0x1c5   :  { %v1016_v63 = vadd.f32 1.0, %v1157_v47 }
 0x1c7   :  { %1158 = vrcp.f32 %v1016_v63 }
 0x1cd   :  { %v1159_v4 = vpop.eup %1158 }
 0x1ce   :  { %1081 = vst.msk [vmem:[%s1959_s2 + $0x40] sm:$0xff] %vm1072_vm4, %v1159_v4 }
 0x1cf   :  { %v785_v49 = vpop.xlane.xlu2 %784 }
 0x1d0   :  { %v880_v5 = vadd.f32 %v1794_v56, %v785_v49 }
 0x1d2   :  { %v912_v21 = vsub.f32 0.0, %v880_v5 }
 0x1d4   :  { %v944_v7 = vmul.f32 1.442695, %v912_v21 }
 0x1d6   :  { %1160 = vpow2.f32 %v944_v7  ;;  %v857_v8 = vpop.xlane.xlu1 %856 }
 0x1d7   :  { %v904_v38 = vadd.f32 %v1794_v56, %v857_v8  ;;  %v833_v2 = vpop.xlane.xlu2 %832 }
 0x1d8   :  { %v896_v52 = vadd.f32 %v1794_v56, %v833_v2  ;;  %v788_v9 = vpop.xlane.xlu0 %787 }
 0x1d9   :  { %v936_v10 = vsub.f32 0.0, %v904_v38  ;;  %v881_v11 = vadd.f32 %v1794_v56, %v788_v9 }
 0x1da   :  { %v928_v12 = vsub.f32 0.0, %v896_v52 }
 0x1db   :  { %v992_v55 = vmul.f32 1.442695, %v936_v10  ;;  %v913_v43 = vsub.f32 0.0, %v881_v11 }
 0x1dc   :  { %v1161_v44 = vpop.eup %1160  ;;  %v976_v61 = vmul.f32 1.442695, %v928_v12 }
 0x1dd   :  { %v1008_v13 = vadd.f32 1.0, %v1161_v44  ;;  %1162 = vpow2.f32 %v992_v55  ;;  %v946_v15 = vmul.f32 1.442695, %v913_v43 }
 0x1de   :  { %1164 = vpow2.f32 %v976_v61 }
 0x1df   :  { %1166 = vrcp.f32 %v1008_v13  ;;  %v860_v60 = vpop.xlane.xlu2 %859  ;;  %v812_v59 = vpop.xlane.xlu1 %811 }
 0x1e0   :  { %1168 = vpow2.f32 %v946_v15  ;;  %v905_v0 = vadd.f32 %v1794_v56, %v860_v60  ;;  %v889_v14 = vadd.f32 %v1794_v56, %v812_v59  ;;  %v836_v19 = vpop.xlane.xlu0 %835 }
 0x1e1   :  { %v897_v6 = vadd.f32 %v1794_v56, %v836_v19 }
 0x1e2   :  { %v937_v41 = vsub.f32 0.0, %v905_v0  ;;  %v921_v42 = vsub.f32 0.0, %v889_v14 }
 0x1e3   :  { %v1163_v20 = vpop.eup %1162  ;;  %v929_v24 = vsub.f32 0.0, %v897_v6 }
 0x1e4   :  { %v1165_v54 = vpop.eup %1164  ;;  %v1032_v25 = vadd.f32 1.0, %v1163_v20  ;;  %v994_v18 = vmul.f32 1.442695, %v937_v41  ;;  %v962_v62 = vmul.f32 1.442695, %v921_v42 }
 0x1e5   :  { %v1167_v23 = vpop.eup %1166  ;;  %v1024_v26 = vadd.f32 1.0, %v1165_v54  ;;  %v978_v28 = vmul.f32 1.442695, %v929_v24 }
 0x1e6   :  { %v1169_v35 = vpop.eup %1168  ;;  %1073 = vst.msk [vmem:[%s1959_s2] sm:$0xff] %vm1072_vm4, %v1167_v23  ;;  %1170 = vrcp.f32 %v1032_v25 }
 0x1e7   :  { %1172 = vrcp.f32 %v1024_v26  ;;  %v1009_v27 = vadd.f32 1.0, %v1169_v35  ;;  %v815_v37 = vpop.xlane.xlu2 %814  ;;  %v791_v29 = vpop.xlane.xlu1 %790 }
 0x1e8   :  { %1174 = vpow2.f32 %v994_v18  ;;  %v890_v1 = vadd.f32 %v1794_v56, %v815_v37  ;;  %v882_v30 = vadd.f32 %v1794_v56, %v791_v29  ;;  %v863_v48 = vpop.xlane.xlu0 %862 }
 0x1e9   :  { %1176 = vrcp.f32 %v1009_v27  ;;  %v906_v31 = vadd.f32 %v1794_v56, %v863_v48 }
 0x1ea   :  { %1178 = vpow2.f32 %v962_v62  ;;  %v922_v33 = vsub.f32 0.0, %v890_v1  ;;  %v914_v36 = vsub.f32 0.0, %v882_v30 }
 0x1eb   :  { %1180 = vpow2.f32 %v978_v28  ;;  %v938_v17 = vsub.f32 0.0, %v906_v31 }
 0x1ec   :  { %v1171_v45 = vpop.eup %1170  ;;  %v964_v57 = vmul.f32 1.442695, %v922_v33  ;;  %v948_v50 = vmul.f32 1.442695, %v914_v36 }
 0x1ed   :  { %v1173_v51 = vpop.eup %1172  ;;  %1097 = vst.msk [vmem:[%s1959_s2 + $0xc0] sm:$0xff] %vm1072_vm4, %v1171_v45  ;;  %v996_v53 = vmul.f32 1.442695, %v938_v17 }
 0x1ee   :  { %v1175_v16 = vpop.eup %1174  ;;  %1089 = vst.msk [vmem:[%s1959_s2 + $0x80] sm:$0xff] %vm1072_vm4, %v1173_v51  ;;  %1182 = vpow2.f32 %v964_v57 }
 0x1ef   :  { %v1177_v22 = vpop.eup %1176  ;;  %v1033_v46 = vadd.f32 1.0, %v1175_v16  ;;  %1184 = vpow2.f32 %v948_v50  ;;  %v794_v39 = vpop.xlane.xlu2 %793 }
 0x1f0   :  { %v839_v32 = vpop.xlane.xlu1 %838  ;;  %v1179_v58 = vpop.eup %1178  ;;  %1074 = vst.msk [vmem:[%s1959_s2 + $0x8] sm:$0xff] %vm1072_vm4, %v1177_v22  ;;  %1186 = vpow2.f32 %v996_v53  ;;  %v883_v40 = vadd.f32 %v1794_v56, %v794_v39 }
 0x1f1   :  { %v898_v3 = vadd.f32 %v1794_v56, %v839_v32  ;;  %v818_v34 = vpop.xlane.xlu0 %817  ;;  %v1181_v47 = vpop.eup %1180  ;;  %1188 = vrcp.f32 %v1033_v46  ;;  %v1017_v63 = vadd.f32 1.0, %v1179_v58 }
 0x1f2   :  { %v891_v4 = vadd.f32 %v1794_v56, %v818_v34  ;;  %v1025_v49 = vadd.f32 1.0, %v1181_v47  ;;  %v915_v5 = vsub.f32 0.0, %v883_v40 }
 0x1f3   :  { %v930_v21 = vsub.f32 0.0, %v898_v3  ;;  %1190 = vrcp.f32 %v1017_v63 }
 0x1f4   :  { %v923_v7 = vsub.f32 0.0, %v891_v4  ;;  %v1183_v8 = vpop.eup %1182  ;;  %1192 = vrcp.f32 %v1025_v49  ;;  %v950_v38 = vmul.f32 1.442695, %v915_v5 }
 0x1f5   :  { %v1185_v2 = vpop.eup %1184  ;;  %v1018_v52 = vadd.f32 1.0, %v1183_v8  ;;  %v980_v11 = vmul.f32 1.442695, %v930_v21 }
 0x1f6   :  { %v1187_v9 = vpop.eup %1186  ;;  %v1010_v10 = vadd.f32 1.0, %v1185_v2  ;;  %1194 = vpow2.f32 %v950_v38  ;;  %v966_v43 = vmul.f32 1.442695, %v923_v7 }
 0x1f7   :  { %v1189_v12 = vpop.eup %1188  ;;  %1196 = vrcp.f32 %v1018_v52  ;;  %v1034_v55 = vadd.f32 1.0, %v1187_v9  ;;  %v842_v61 = vpop.xlane.xlu2 %841 }
 0x1f8   :  { %v866_v44 = vpop.xlane.xlu1 %865  ;;  %1098 = vst.msk [vmem:[%s1959_s2 + $0xc8] sm:$0xff] %vm1072_vm4, %v1189_v12  ;;  %1198 = vrcp.f32 %v1010_v10  ;;  %v899_v15 = vadd.f32 %v1794_v56, %v842_v61 }
 0x1f9   :  { %v907_v13 = vadd.f32 %v1794_v56, %v866_v44  ;;  %v1191_v60 = vpop.eup %1190  ;;  %1200 = vrcp.f32 %v1034_v55 }
 0x1fa   :  { %v1193_v59 = vpop.eup %1192  ;;  %1082 = vst.msk [vmem:[%s1959_s2 + $0x48] sm:$0xff] %vm1072_vm4, %v1191_v60  ;;  %1202 = vpow2.f32 %v980_v11  ;;  %v931_v14 = vsub.f32 0.0, %v899_v15 }
 0x1fb   :  { %v939_v0 = vsub.f32 0.0, %v907_v13  ;;  %1090 = vst.msk [vmem:[%s1959_s2 + $0x88] sm:$0xff] %vm1072_vm4, %v1193_v59  ;;  %1204 = vpow2.f32 %v966_v43 }
 0x1fc   :  { %v1195_v19 = vpop.eup %1194  ;;  %v982_v41 = vmul.f32 1.442695, %v931_v14 }
 0x1fd   :  { %v998_v6 = vmul.f32 1.442695, %v939_v0  ;;  %v1197_v42 = vpop.eup %1196  ;;  %v1011_v20 = vadd.f32 1.0, %v1195_v19  ;;  %v845_v24 = vpop.xlane.xlu0 %844 }
 0x1fe   :  { %v1199_v54 = vpop.eup %1198  ;;  %1083 = vst.msk [vmem:[%s1959_s2 + $0x50] sm:$0xff] %vm1072_vm4, %v1197_v42  ;;  %v900_v25 = vadd.f32 %v1794_v56, %v845_v24 }
 0x1ff   :  { %1206 = vpow2.f32 %v998_v6  ;;  %v1201_v18 = vpop.eup %1200  ;;  %1075 = vst.msk [vmem:[%s1959_s2 + $0x10] sm:$0xff] %vm1072_vm4, %v1199_v54  ;;  %v797_v26 = vpop.xlane.xlu2 %796 }
 0x200   :  { %1208 = vrcp.f32 %v1011_v20  ;;  %v821_v23 = vpop.xlane.xlu1 %820  ;;  %v1203_v35 = vpop.eup %1202  ;;  %1099 = vst.msk [vmem:[%s1959_s2 + $0xd0] sm:$0xff] %vm1072_vm4, %v1201_v18  ;;  %v932_v62 = vsub.f32 0.0, %v900_v25  ;;  %v884_v28 = vadd.f32 %v1794_v56, %v797_v26 }
 0x201   :  { %1210 = vpow2.f32 %v982_v41  ;;  %v892_v27 = vadd.f32 %v1794_v56, %v821_v23  ;;  %v1205_v37 = vpop.eup %1204  ;;  %v1026_v29 = vadd.f32 1.0, %v1203_v35 }
 0x202   :  { %v1019_v1 = vadd.f32 1.0, %v1205_v37  ;;  %v984_v30 = vmul.f32 1.442695, %v932_v62  ;;  %v916_v31 = vsub.f32 0.0, %v884_v28 }
 0x203   :  { %v924_v48 = vsub.f32 0.0, %v892_v27  ;;  %1212 = vrcp.f32 %v1026_v29 }
 0x204   :  { %1214 = vrcp.f32 %v1019_v1  ;;  %v952_v17 = vmul.f32 1.442695, %v916_v31 }
 0x205   :  { %v1207_v33 = vpop.eup %1206  ;;  %v968_v36 = vmul.f32 1.442695, %v924_v48  ;;  %1216 = vpow2.f32 %v984_v30 }
 0x206   :  { %v1209_v45 = vpop.eup %1208  ;;  %v1035_v57 = vadd.f32 1.0, %v1207_v33 }
 0x207   :  { %v1211_v50 = vpop.eup %1210  ;;  %1076 = vst.msk [vmem:[%s1959_s2 + $0x18] sm:$0xff] %vm1072_vm4, %v1209_v45  ;;  %1218 = vpow2.f32 %v968_v36  ;;  %v800_v16 = vpop.xlane.xlu0 %799 }
 0x208   :  { %1220 = vrcp.f32 %v1035_v57  ;;  %v1027_v51 = vadd.f32 1.0, %v1211_v50  ;;  %v848_v53 = vpop.xlane.xlu1 %847  ;;  %v869_v46 = vpop.xlane.xlu2 %868  ;;  %v885_v39 = vadd.f32 %v1794_v56, %v800_v16 }
 0x209   :  { %1222 = vpow2.f32 %v952_v17  ;;  %v901_v22 = vadd.f32 %v1794_v56, %v848_v53  ;;  %v1213_v32 = vpop.eup %1212  ;;  %v908_v58 = vadd.f32 %v1794_v56, %v869_v46 }
 0x20a   :  { %1224 = vrcp.f32 %v1027_v51  ;;  %v1215_v40 = vpop.eup %1214  ;;  %1091 = vst.msk [vmem:[%s1959_s2 + $0x90] sm:$0xff] %vm1072_vm4, %v1213_v32  ;;  %v917_v63 = vsub.f32 0.0, %v885_v39 }
 0x20b   :  { %v933_v3 = vsub.f32 0.0, %v901_v22  ;;  %v1217_v34 = vpop.eup %1216  ;;  %1084 = vst.msk [vmem:[%s1959_s2 + $0x58] sm:$0xff] %vm1072_vm4, %v1215_v40  ;;  %v940_v47 = vsub.f32 0.0, %v908_v58 }
 0x20c   :  { %v1028_v49 = vadd.f32 1.0, %v1217_v34  ;;  %v954_v9 = vmul.f32 1.442695, %v917_v63 }
 0x20d   :  { %v1219_v4 = vpop.eup %1218  ;;  %v986_v5 = vmul.f32 1.442695, %v933_v3  ;;  %v1000_v38 = vmul.f32 1.442695, %v940_v47 }
 0x20e   :  { %v1221_v21 = vpop.eup %1220  ;;  %v1020_v7 = vadd.f32 1.0, %v1219_v4  ;;  %1226 = vrcp.f32 %v1028_v49 }
 0x20f   :  { %v1223_v8 = vpop.eup %1222  ;;  %1100 = vst.msk [vmem:[%s1959_s2 + $0xd8] sm:$0xff] %vm1072_vm4, %v1221_v21 }
 0x210   :  { %v1225_v2 = vpop.eup %1224  ;;  %1228 = vrcp.f32 %v1020_v7  ;;  %v1012_v52 = vadd.f32 1.0, %v1223_v8  ;;  %v803_v10 = vpop.xlane.xlu1 %802 }
 0x211   :  { %1092 = vst.msk [vmem:[%s1959_s2 + $0x98] sm:$0xff] %vm1072_vm4, %v1225_v2  ;;  %1230 = vpow2.f32 %v986_v5  ;;  %v886_v11 = vadd.f32 %v1794_v56, %v803_v10  ;;  %v824_v12 = vpop.xlane.xlu2 %823  ;;  %v827_v55 = vpop.xlane.xlu0 %826 }
 0x212   :  { %1232 = vrcp.f32 %v1012_v52  ;;  %v893_v43 = vadd.f32 %v1794_v56, %v824_v12  ;;  %v894_v44 = vadd.f32 %v1794_v56, %v827_v55 }
 0x213   :  { %1234 = vpow2.f32 %v1000_v38  ;;  %v918_v61 = vsub.f32 0.0, %v886_v11 }
 0x214   :  { %1236 = vpow2.f32 %v954_v9  ;;  %v925_v13 = vsub.f32 0.0, %v893_v43  ;;  %v926_v15 = vsub.f32 0.0, %v894_v44  ;;  %v1227_v60 = vpop.eup %1226 }
 0x215   :  { %v956_v59 = vmul.f32 1.442695, %v918_v61  ;;  %1093 = vst.msk [vmem:[%s1959_s2 + $0xa0] sm:$0xff] %vm1072_vm4, %v1227_v60 }
 0x216   :  { %v1229_v0 = vpop.eup %1228  ;;  %v970_v14 = vmul.f32 1.442695, %v925_v13  ;;  %v972_v19 = vmul.f32 1.442695, %v926_v15 }
 0x217   :  { %v1231_v6 = vpop.eup %1230  ;;  %1085 = vst.msk [vmem:[%s1959_s2 + $0x60] sm:$0xff] %vm1072_vm4, %v1229_v0  ;;  %1238 = vpow2.f32 %v956_v59 }
 0x218   :  { %v1233_v41 = vpop.eup %1232  ;;  %v1029_v42 = vadd.f32 1.0, %v1231_v6  ;;  %1240 = vpow2.f32 %v970_v14 }
 0x219   :  { %v1235_v20 = vpop.eup %1234  ;;  %1077 = vst.msk [vmem:[%s1959_s2 + $0x20] sm:$0xff] %vm1072_vm4, %v1233_v41  ;;  %1242 = vpow2.f32 %v972_v19  ;;  %v851_v24 = vpop.xlane.xlu2 %850 }
 0x21a   :  { %v1237_v54 = vpop.eup %1236  ;;  %1244 = vrcp.f32 %v1029_v42  ;;  %v1036_v25 = vadd.f32 1.0, %v1235_v20  ;;  %v902_v18 = vadd.f32 %v1794_v56, %v851_v24 }
 0x21b   :  { %v1013_v23 = vadd.f32 1.0, %v1237_v54 }
 0x21c   :  { %1246 = vrcp.f32 %v1036_v25  ;;  %v934_v26 = vsub.f32 0.0, %v902_v18 }
 0x21d   :  { %v1239_v35 = vpop.eup %1238  ;;  %1248 = vrcp.f32 %v1013_v23  ;;  %v854_v28 = vpop.xlane.xlu0 %853 }
 0x21e   :  { %v1241_v62 = vpop.eup %1240  ;;  %v1014_v27 = vadd.f32 1.0, %v1239_v35  ;;  %v988_v1 = vmul.f32 1.442695, %v934_v26  ;;  %v903_v30 = vadd.f32 %v1794_v56, %v854_v28 }
 0x21f   :  { %v1243_v37 = vpop.eup %1242  ;;  %v1021_v29 = vadd.f32 1.0, %v1241_v62  ;;  %v830_v33 = vpop.xlane.xlu1 %829 }
 0x220   :  { %v1245_v48 = vpop.eup %1244  ;;  %1250 = vrcp.f32 %v1014_v27  ;;  %v1022_v31 = vadd.f32 1.0, %v1243_v37  ;;  %v935_v36 = vsub.f32 0.0, %v903_v30  ;;  %v895_v17 = vadd.f32 %v1794_v56, %v830_v33 }
 0x221   :  { %1094 = vst.msk [vmem:[%s1959_s2 + $0xa8] sm:$0xff] %vm1072_vm4, %v1245_v48  ;;  %1252 = vrcp.f32 %v1021_v29  ;;  %v806_v45 = vpop.xlane.xlu2 %805 }
 0x222   :  { %v1247_v57 = vpop.eup %1246  ;;  %1254 = vrcp.f32 %v1022_v31  ;;  %v887_v50 = vadd.f32 %v1794_v56, %v806_v45  ;;  %v990_v53 = vmul.f32 1.442695, %v935_v36  ;;  %v927_v16 = vsub.f32 0.0, %v895_v17 }
 0x223   :  { %v1249_v51 = vpop.eup %1248  ;;  %1101 = vst.msk [vmem:[%s1959_s2 + $0xe0] sm:$0xff] %vm1072_vm4, %v1247_v57  ;;  %1256 = vpow2.f32 %v988_v1 }
 0x224   :  { %1078 = vst.msk [vmem:[%s1959_s2 + $0x28] sm:$0xff] %vm1072_vm4, %v1249_v51  ;;  %v919_v22 = vsub.f32 0.0, %v887_v50  ;;  %1258 = vpow2.f32 %v990_v53  ;;  %v974_v46 = vmul.f32 1.442695, %v927_v16 }
 0x225   :  { %v872_v58 = vpop.xlane.xlu0 %871 }
 0x226   :  { %v1251_v39 = vpop.eup %1250  ;;  %v958_v32 = vmul.f32 1.442695, %v919_v22  ;;  %1260 = vpow2.f32 %v974_v46  ;;  %v909_v3 = vadd.f32 %v1794_v56, %v872_v58 }
 0x227   :  { %v1253_v40 = vpop.eup %1252  ;;  %1079 = vst.msk [vmem:[%s1959_s2 + $0x30] sm:$0xff] %vm1072_vm4, %v1251_v39  ;;  %v875_v47 = vpop.xlane.xlu1 %874 }
 0x228   :  { %v1255_v34 = vpop.eup %1254  ;;  %1086 = vst.msk [vmem:[%s1959_s2 + $0x68] sm:$0xff] %vm1072_vm4, %v1253_v40  ;;  %1262 = vpow2.f32 %v958_v32  ;;  %v941_v4 = vsub.f32 0.0, %v909_v3  ;;  %v910_v49 = vadd.f32 %v1794_v56, %v875_v47 }
 0x229   :  { %v1257_v63 = vpop.eup %1256  ;;  %1087 = vst.msk [vmem:[%s1959_s2 + $0x70] sm:$0xff] %vm1072_vm4, %v1255_v34  ;;  %v878_v5 = vpop.xlane.xlu2 %877 }
 0x22a   :  { %v1030_v21 = vadd.f32 1.0, %v1257_v63  ;;  %v911_v7 = vadd.f32 %v1794_v56, %v878_v5  ;;  %v1259_v8 = vpop.eup %1258  ;;  %v1002_v38 = vmul.f32 1.442695, %v941_v4  ;;  %v942_v2 = vsub.f32 0.0, %v910_v49 }
 0x22b   :  { %v1031_v52 = vadd.f32 1.0, %v1259_v8 }
 0x22c   :  { %1264 = vrcp.f32 %v1030_v21  ;;  %v943_v9 = vsub.f32 0.0, %v911_v7  ;;  %v1261_v10 = vpop.eup %1260  ;;  %v1004_v11 = vmul.f32 1.442695, %v942_v2 }
 0x22d   :  { %1266 = vpow2.f32 %v1002_v38  ;;  %v1023_v55 = vadd.f32 1.0, %v1261_v10 }
 0x22e   :  { %v1263_v12 = vpop.eup %1262  ;;  %1268 = vrcp.f32 %v1031_v52  ;;  %v1006_v43 = vmul.f32 1.442695, %v943_v9 }
 0x22f   :  { %v1015_v44 = vadd.f32 1.0, %v1263_v12  ;;  %1270 = vpow2.f32 %v1004_v11 }
 0x230   :  { %1272 = vrcp.f32 %v1023_v55 }
 0x231   :  { %1274 = vrcp.f32 %v1015_v44 }
 0x232   :  { %v1265_v61 = vpop.eup %1264  ;;  %1276 = vpow2.f32 %v1006_v43 }
 0x233   :  { %v1267_v56 = vpop.eup %1266  ;;  %1095 = vst.msk [vmem:[%s1959_s2 + $0xb0] sm:$0xff] %vm1072_vm4, %v1265_v61 }
 0x234   :  { %v1269_v13 = vpop.eup %1268  ;;  %v1037_v15 = vadd.f32 1.0, %v1267_v56 }
 0x235   :  { %v1271_v60 = vpop.eup %1270  ;;  %1096 = vst.msk [vmem:[%s1959_s2 + $0xb8] sm:$0xff] %vm1072_vm4, %v1269_v13 }
 0x236   :  { %v1273_v59 = vpop.eup %1272  ;;  %1278 = vrcp.f32 %v1037_v15  ;;  %v1038_v0 = vadd.f32 1.0, %v1271_v60 }
 0x237   :  { %v1275_v14 = vpop.eup %1274  ;;  %1088 = vst.msk [vmem:[%s1959_s2 + $0x78] sm:$0xff] %vm1072_vm4, %v1273_v59 }
 0x238   :  { %v1277_v19 = vpop.eup %1276  ;;  %1080 = vst.msk [vmem:[%s1959_s2 + $0x38] sm:$0xff] %vm1072_vm4, %v1275_v14  ;;  %1280 = vrcp.f32 %v1038_v0 }
 0x239   :  { %v1039_v6 = vadd.f32 1.0, %v1277_v19 }
 0x23b   :  { %1282 = vrcp.f32 %v1039_v6 }
 0x23c   :  { %v1279_v41 = vpop.eup %1278 }
 0x23d   :  { %1102 = vst.msk [vmem:[%s1959_s2 + $0xe8] sm:$0xff] %vm1072_vm4, %v1279_v41 }
 0x23e   :  { %v1281_v42 = vpop.eup %1280 }
 0x23f   :  { %1103 = vst.msk [vmem:[%s1959_s2 + $0xf0] sm:$0xff] %vm1072_vm4, %v1281_v42 }
 0x241   :  { %v1283_v20 = vpop.eup %1282 }
 0x242   :  { %1104 = vst.msk [vmem:[%s1959_s2 + $0xf8] sm:$0xff] %vm1072_vm4, %v1283_v20 }

</bundles_post_ra>
